<compile_context>
chip_gen: v6e
topology: v6e:2x2x1
jax: 0.10.0
libtpu: 0.0.40
codegen_flags: <defaults>
</compile_context>

<pallas_src>
import functools

import jax
import jax.numpy as jnp
import numpy as np
from jax.experimental import pallas as pl
from jax.experimental.pallas import tpu as pltpu


# ----------------------------------------------------------------------------
# Fused Pallas kernel: all five embedding outputs in one launch.
# ----------------------------------------------------------------------------
def _embeddings_kernel(
    # patch path
    patches_ref,   # (B, P, Cpp)
    patch_w_ref,   # (Cpp, H)
    pe_patch_ref,  # (P, H)   = pos_emb[0, 1:, :] + patch_bias
    cls_ref,       # (1, H)   = cls_token + pos_emb[0, 0, :]
    # rr path
    rr_ref,        # (B, T, 768)
    rr_w_ref,      # (768, H)
    pe_rr_ref,     # (T, H)   = pe_rr + rr_bias
    # K == 1 paths (VPU only)
    img_ref,       # (B, NI, 1)
    img_w_ref,     # (1, H)
    pe_img_ref,    # (NI, H)  = pe_img_fea + img_bias
    sex_ref,       # (B, 1, 1)
    sex_w_ref,     # (1, H)
    pe_sex_ref,    # (1, H)   = pe_sex + sex_bias
    age_ref,       # (B, 1, 1)
    age_w_ref,     # (1, H)
    pe_age_ref,    # (1, H)   = pe_age + age_bias
    # outputs
    emb_ref,       # (B, 1 + P, H)
    rr_o_ref,      # (B, T, H)
    img_o_ref,     # (B, NI, H)
    sex_o_ref,     # (B, 1, H)
    age_o_ref,     # (B, 1, H)
):
    B, P, Cpp = patches_ref.shape
    H = patch_w_ref.shape[1]

    # --- image patches: conv-as-matmul, batch folded into the MXU M dim ---
    x2 = patches_ref[...].reshape(B * P, Cpp)
    acc = jnp.dot(x2, patch_w_ref[...], preferred_element_type=jnp.float32)
    acc = acc.reshape(B, P, H) + pe_patch_ref[...][None, :, :]
    emb_ref[:, 1:, :] = acc.astype(emb_ref.dtype)
    # cls row (cls_token + pos_emb[0]) written in-kernel -> no XLA concatenate.
    cls_rows = jnp.broadcast_to(cls_ref[...][None, :, :], (B, 1, H))
    emb_ref[:, 0:1, :] = cls_rows.astype(emb_ref.dtype)

    # --- rr: Linear(768, H), batch folded into the MXU M dim ---
    Bt, T, Kr = rr_ref.shape
    rr2 = rr_ref[...].reshape(Bt * T, Kr)
    rr_acc = jnp.dot(rr2, rr_w_ref[...], preferred_element_type=jnp.float32)
    rr_o_ref[...] = (rr_acc.reshape(Bt, T, H)
                     + pe_rr_ref[...][None, :, :]).astype(rr_o_ref.dtype)

    # --- K == 1 linears: pure VPU broadcast multiply-add (MXU not used) ---
    img_o_ref[...] = (img_ref[...] * img_w_ref[...][None, :, :]
                      + pe_img_ref[...][None, :, :]).astype(img_o_ref.dtype)
    sex_o_ref[...] = (sex_ref[...] * sex_w_ref[...][None, :, :]
                      + pe_sex_ref[...][None, :, :]).astype(sex_o_ref.dtype)
    age_o_ref[...] = (age_ref[...] * age_w_ref[...][None, :, :]
                      + pe_age_ref[...][None, :, :]).astype(age_o_ref.dtype)


def _full_block(shape):
    zeros = (0,) * len(shape)
    return pl.BlockSpec(shape, lambda i, _z=zeros: _z)


# ----------------------------------------------------------------------------
# Glue: extract non-overlapping patches from NCHW image (conv-as-matmul).
# ----------------------------------------------------------------------------
def extract_patches(x, p):
    """NCHW -> (B, n_patches, C*p*p) with (c, kh, kw) feature order, matching
    Conv2d weight (out, c, kh, kw).reshape(out, -1)."""
    # TODO(synk): at production image sizes fold this transpose into the
    # pallas_call input (index_map over patch rows / allow_input_fusion) to
    # avoid the extra HBM round trip.
    B, C, H, W = x.shape
    x = x.reshape(B, C, H // p, p, W // p, p)
    x = x.transpose(0, 2, 4, 1, 3, 5)
    return x.reshape(B, (H // p) * (W // p), C * p * p)


# ----------------------------------------------------------------------------
# Parameter construction (deterministic, synthetic — no checkpoint loading)
# ----------------------------------------------------------------------------
def init_params(key, *, in_channels, patch, hidden, n_patches, tk_lim, num_img_fea):
    keys = jax.random.split(key, 16)
    s = 0.02
    p = {}
    conv_w = s * jax.random.normal(keys[0], (hidden, in_channels, patch, patch), jnp.float32)
    p["patch_w"] = conv_w.reshape(hidden, in_channels * patch * patch).T     # (Cpp, hidden)
    p["patch_b"] = s * jax.random.normal(keys[1], (hidden,), jnp.float32)
    p["rr_w"] = s * jax.random.normal(keys[2], (768, hidden), jnp.float32)
    p["rr_b"] = s * jax.random.normal(keys[3], (hidden,), jnp.float32)
    p["img_w"] = s * jax.random.normal(keys[4], (1, hidden), jnp.float32)
    p["img_b"] = s * jax.random.normal(keys[5], (hidden,), jnp.float32)
    p["sex_w"] = s * jax.random.normal(keys[6], (1, hidden), jnp.float32)
    p["sex_b"] = s * jax.random.normal(keys[7], (hidden,), jnp.float32)
    p["age_w"] = s * jax.random.normal(keys[8], (1, hidden), jnp.float32)
    p["age_b"] = s * jax.random.normal(keys[9], (hidden,), jnp.float32)
    p["pos_emb"] = s * jax.random.normal(keys[10], (1, 1 + n_patches, hidden), jnp.float32)
    p["pe_rr"] = s * jax.random.normal(keys[11], (1, tk_lim, hidden), jnp.float32)
    p["pe_img"] = s * jax.random.normal(keys[12], (1, num_img_fea, hidden), jnp.float32)
    p["pe_sex"] = s * jax.random.normal(keys[13], (1, 1, hidden), jnp.float32)
    p["pe_age"] = s * jax.random.normal(keys[14], (1, 1, hidden), jnp.float32)
    p["cls"] = s * jax.random.normal(keys[15], (1, 1, hidden), jnp.float32)
    return p


# ----------------------------------------------------------------------------
# Forward pass: one fused pallas_call; reshapes / bias folding are XLA glue.
# ----------------------------------------------------------------------------
@functools.partial(jax.jit, static_argnames=("patch",))
def embeddings_forward(params, x, rr, img_fea, sex, age, *, patch):
    B = x.shape[0]
    H = params["patch_w"].shape[1]

    patches = extract_patches(x, patch)                   # (B, P, C*p*p)
    P = patches.shape[1]
    T = rr.shape[1]
    NI = img_fea.shape[1]

    # Fold linear biases into the positional embeddings (pe' = pe + b).
    pe_patch = params["pos_emb"][0, 1:, :] + params["patch_b"][None, :]   # (P, H)
    cls_row = params["cls"][0] + params["pos_emb"][0, 0:1, :]             # (1, H)
    pe_rr = params["pe_rr"][0] + params["rr_b"][None, :]                  # (T, H)
    pe_img = params["pe_img"][0] + params["img_b"][None, :]               # (NI, H)
    pe_sex = params["pe_sex"][0] + params["sex_b"][None, :]               # (1, H)
    pe_age = params["pe_age"][0] + params["age_b"][None, :]               # (1, H)

    out_shape = (
        jax.ShapeDtypeStruct((B, 1 + P, H), jnp.float32),
        jax.ShapeDtypeStruct((B, T, H), jnp.float32),
        jax.ShapeDtypeStruct((B, NI, H), jnp.float32),
        jax.ShapeDtypeStruct((B, 1, H), jnp.float32),
        jax.ShapeDtypeStruct((B, 1, H), jnp.float32),
    )

    inputs = (
        patches, params["patch_w"], pe_patch, cls_row,
        rr, params["rr_w"], pe_rr,
        img_fea, params["img_w"], pe_img,
        sex, params["sex_w"], pe_sex,
        age, params["age_w"], pe_age,
    )

    return pl.pallas_call(
        _embeddings_kernel,
        out_shape=out_shape,
        grid=(1,),   # single step: whole problem is VMEM-resident at these
                     # shapes; at production sizes tile rows (128/256) here.
        in_specs=[_full_block(a.shape) for a in inputs],
        out_specs=tuple(_full_block(s.shape) for s in out_shape),
        compiler_params=pltpu.CompilerParams(dimension_semantics=("arbitrary",)),
    )(*inputs)


# ----------------------------------------------------------------------------
# Pure-JAX reference for correctness checking
# ----------------------------------------------------------------------------
def embeddings_reference(params, x, rr, img_fea, sex, age, *, patch):
    B = x.shape[0]
    hidden = params["patch_w"].shape[1]
    patches = extract_patches(x, patch)
    xproj = patches @ params["patch_w"] + params["patch_b"]
    cls = jnp.broadcast_to(params["cls"], (B, 1, hidden))
    emb = jnp.concatenate([cls, xproj], axis=1) + params["pos_emb"]
    rr_e = rr @ params["rr_w"] + params["rr_b"] + params["pe_rr"]
    img_e = img_fea @ params["img_w"] + params["img_b"] + params["pe_img"]
    sex_e = sex @ params["sex_w"] + params["sex_b"] + params["pe_sex"]
    age_e = age @ params["age_w"] + params["age_b"] + params["pe_age"]
    return emb, rr_e, img_e, sex_e, age_e


if __name__ == "__main__":
    # Small shapes consistent with the module's forward:
    B, C, IMG, PATCH = 2, 3, 16, 4
    HIDDEN = 32
    TK_LIM = 8          # config.rr_len
    NUM_IMG_FEA = 4     # config.img_fea_len
    N_PATCHES = (IMG // PATCH) * (IMG // PATCH)   # 16

    key = jax.random.PRNGKey(0)
    k_p, k_x, k_rr, k_if, k_sx, k_ag = jax.random.split(key, 6)

    params = init_params(k_p, in_channels=C, patch=PATCH, hidden=HIDDEN,
                         n_patches=N_PATCHES, tk_lim=TK_LIM, num_img_fea=NUM_IMG_FEA)

    x = jax.random.normal(k_x, (B, C, IMG, IMG), jnp.float32)        # NCHW
    rr = jax.random.normal(k_rr, (B, TK_LIM, 768), jnp.float32)
    img_fea = jax.random.normal(k_if, (B, NUM_IMG_FEA, 1), jnp.float32)
    sex = jax.random.normal(k_sx, (B, 1, 1), jnp.float32)
    age = jax.random.normal(k_ag, (B, 1, 1), jnp.float32)

    outs = embeddings_forward(params, x, rr, img_fea, sex, age, patch=PATCH)
    outs = jax.block_until_ready(outs)
    refs = embeddings_reference(params, x, rr, img_fea, sex, age, patch=PATCH)

    expected_shapes = [
        (B, 1 + N_PATCHES, HIDDEN),
        (B, TK_LIM, HIDDEN),
        (B, NUM_IMG_FEA, HIDDEN),
        (B, 1, HIDDEN),
        (B, 1, HIDDEN),
    ]
    for o, r, es in zip(outs, refs, expected_shapes):
        assert o.shape == es, (o.shape, es)
        np.testing.assert_allclose(np.asarray(o), np.asarray(r), rtol=1e-5, atol=1e-5)

    print("KERNEL_OK")
</pallas_src>

<mosaic_0001>
module attributes {stable_mosaic.version = 11 : i64} {
  func.func @_embeddings_kernel(%arg0: i32, %arg1: memref<2x16x48xf32, #tpu.memory_space<vmem>>, %arg2: memref<48x32xf32, #tpu.memory_space<vmem>>, %arg3: memref<16x32xf32, #tpu.memory_space<vmem>>, %arg4: memref<1x32xf32, #tpu.memory_space<vmem>>, %arg5: memref<2x8x768xf32, #tpu.memory_space<vmem>>, %arg6: memref<768x32xf32, #tpu.memory_space<vmem>>, %arg7: memref<8x32xf32, #tpu.memory_space<vmem>>, %arg8: memref<2x4x1xf32, #tpu.memory_space<vmem>>, %arg9: memref<1x32xf32, #tpu.memory_space<vmem>>, %arg10: memref<4x32xf32, #tpu.memory_space<vmem>>, %arg11: memref<2x1x1xf32, #tpu.memory_space<vmem>>, %arg12: memref<1x32xf32, #tpu.memory_space<vmem>>, %arg13: memref<1x32xf32, #tpu.memory_space<vmem>>, %arg14: memref<2x1x1xf32, #tpu.memory_space<vmem>>, %arg15: memref<1x32xf32, #tpu.memory_space<vmem>>, %arg16: memref<1x32xf32, #tpu.memory_space<vmem>>, %arg17: memref<2x17x32xf32, #tpu.memory_space<vmem>>, %arg18: memref<2x8x32xf32, #tpu.memory_space<vmem>>, %arg19: memref<2x4x32xf32, #tpu.memory_space<vmem>>, %arg20: memref<2x1x32xf32, #tpu.memory_space<vmem>>, %arg21: memref<2x1x32xf32, #tpu.memory_space<vmem>>) attributes {dimension_semantics = [#tpu.dimension_semantics<arbitrary>], iteration_bounds = array<i64: 1>, scalar_prefetch = 0 : i64, scratch_operands = 0 : i64, tpu.core_type = #tpu.core_type<tc>, window_params = [{pipeline_mode = #tpu.pipeline_mode<synchronous>, transform_indices = @transform_0, window_bounds = array<i64: 2, 16, 48>}, {pipeline_mode = #tpu.pipeline_mode<synchronous>, transform_indices = @transform_1, window_bounds = array<i64: 48, 32>}, {pipeline_mode = #tpu.pipeline_mode<synchronous>, transform_indices = @transform_2, window_bounds = array<i64: 16, 32>}, {pipeline_mode = #tpu.pipeline_mode<synchronous>, transform_indices = @transform_3, window_bounds = array<i64: 1, 32>}, {pipeline_mode = #tpu.pipeline_mode<synchronous>, transform_indices = @transform_4, window_bounds = array<i64: 2, 8, 768>}, {pipeline_mode = #tpu.pipeline_mode<synchronous>, transform_indices = @transform_5, window_bounds = array<i64: 768, 32>}, {pipeline_mode = #tpu.pipeline_mode<synchronous>, transform_indices = @transform_6, window_bounds = array<i64: 8, 32>}, {pipeline_mode = #tpu.pipeline_mode<synchronous>, transform_indices = @transform_7, window_bounds = array<i64: 2, 4, 1>}, {pipeline_mode = #tpu.pipeline_mode<synchronous>, transform_indices = @transform_8, window_bounds = array<i64: 1, 32>}, {pipeline_mode = #tpu.pipeline_mode<synchronous>, transform_indices = @transform_9, window_bounds = array<i64: 4, 32>}, {pipeline_mode = #tpu.pipeline_mode<synchronous>, transform_indices = @transform_10, window_bounds = array<i64: 2, 1, 1>}, {pipeline_mode = #tpu.pipeline_mode<synchronous>, transform_indices = @transform_11, window_bounds = array<i64: 1, 32>}, {pipeline_mode = #tpu.pipeline_mode<synchronous>, transform_indices = @transform_12, window_bounds = array<i64: 1, 32>}, {pipeline_mode = #tpu.pipeline_mode<synchronous>, transform_indices = @transform_13, window_bounds = array<i64: 2, 1, 1>}, {pipeline_mode = #tpu.pipeline_mode<synchronous>, transform_indices = @transform_14, window_bounds = array<i64: 1, 32>}, {pipeline_mode = #tpu.pipeline_mode<synchronous>, transform_indices = @transform_15, window_bounds = array<i64: 1, 32>}, {pipeline_mode = #tpu.pipeline_mode<synchronous>, transform_indices = @transform_16, window_bounds = array<i64: 2, 17, 32>}, {pipeline_mode = #tpu.pipeline_mode<synchronous>, transform_indices = @transform_17, window_bounds = array<i64: 2, 8, 32>}, {pipeline_mode = #tpu.pipeline_mode<synchronous>, transform_indices = @transform_18, window_bounds = array<i64: 2, 4, 32>}, {pipeline_mode = #tpu.pipeline_mode<synchronous>, transform_indices = @transform_19, window_bounds = array<i64: 2, 1, 32>}, {pipeline_mode = #tpu.pipeline_mode<synchronous>, transform_indices = @transform_20, window_bounds = array<i64: 2, 1, 32>}]} {
    %c0 = arith.constant 0 : index
    %c0_0 = arith.constant 0 : index
    %c0_1 = arith.constant 0 : index
    %0 = vector.load %arg1[%c0, %c0_0, %c0_1] : memref<2x16x48xf32, #tpu.memory_space<vmem>>, vector<2x16x48xf32>
    %1 = vector.shape_cast %0 : vector<2x16x48xf32> to vector<32x48xf32>
    %c0_2 = arith.constant 0 : index
    %c0_3 = arith.constant 0 : index
    %2 = vector.load %arg2[%c0_2, %c0_3] : memref<48x32xf32, #tpu.memory_space<vmem>>, vector<48x32xf32>
    %cst = arith.constant dense<0.000000e+00> : vector<32x32xf32>
    %3 = tpu.matmul %1, %2, %cst {dimension_numbers = #tpu.dot_dimension_numbers<[1], [0], [0], [1], [0, 0, 1, 1], [], []>} : vector<32x48xf32>, vector<48x32xf32>, vector<32x32xf32> -> vector<32x32xf32>
    %4 = vector.shape_cast %3 : vector<32x32xf32> to vector<2x16x32xf32>
    %c0_4 = arith.constant 0 : index
    %c0_5 = arith.constant 0 : index
    %5 = vector.load %arg3[%c0_4, %c0_5] : memref<16x32xf32, #tpu.memory_space<vmem>>, vector<16x32xf32>
    %6 = vector.shape_cast %5 : vector<16x32xf32> to vector<1x16x32xf32>
    %7 = vector.broadcast %6 : vector<1x16x32xf32> to vector<2x16x32xf32>
    %8 = arith.addf %4, %7 : vector<2x16x32xf32>
    %c0_6 = arith.constant 0 : index
    %c1 = arith.constant 1 : index
    %c0_7 = arith.constant 0 : index
    %9 = vector.load %arg17[%c0_6, %c1, %c0_7] : memref<2x17x32xf32, #tpu.memory_space<vmem>>, vector<2x16x32xf32>
    tpu.vector_store %arg17[%c0_6, %c1, %c0_7], %8 {strides = array<i32>} : memref<2x17x32xf32, #tpu.memory_space<vmem>>, vector<2x16x32xf32>,
    %c0_8 = arith.constant 0 : index
    %c0_9 = arith.constant 0 : index
    %10 = vector.load %arg4[%c0_8, %c0_9] : memref<1x32xf32, #tpu.memory_space<vmem>>, vector<1x32xf32>
    %11 = vector.shape_cast %10 : vector<1x32xf32> to vector<1x1x32xf32>
    %12 = vector.shape_cast %11 : vector<1x1x32xf32> to vector<1x1x32xf32>
    %13 = vector.broadcast %12 : vector<1x1x32xf32> to vector<2x1x32xf32>
    %c0_10 = arith.constant 0 : index
    %c0_11 = arith.constant 0 : index
    %c0_12 = arith.constant 0 : index
    %14 = vector.load %arg17[%c0_10, %c0_11, %c0_12] : memref<2x17x32xf32, #tpu.memory_space<vmem>>, vector<2x1x32xf32>
    tpu.vector_store %arg17[%c0_10, %c0_11, %c0_12], %13 {strides = array<i32>} : memref<2x17x32xf32, #tpu.memory_space<vmem>>, vector<2x1x32xf32>,
    %c0_13 = arith.constant 0 : index
    %c0_14 = arith.constant 0 : index
    %c0_15 = arith.constant 0 : index
    %15 = vector.load %arg5[%c0_13, %c0_14, %c0_15] : memref<2x8x768xf32, #tpu.memory_space<vmem>>, vector<2x8x768xf32>
    %16 = vector.shape_cast %15 : vector<2x8x768xf32> to vector<16x768xf32>
    %c0_16 = arith.constant 0 : index
    %c0_17 = arith.constant 0 : index
    %17 = vector.load %arg6[%c0_16, %c0_17] : memref<768x32xf32, #tpu.memory_space<vmem>>, vector<768x32xf32>
    %cst_18 = arith.constant dense<0.000000e+00> : vector<16x32xf32>
    %18 = tpu.matmul %16, %17, %cst_18 {dimension_numbers = #tpu.dot_dimension_numbers<[1], [0], [0], [1], [0, 0, 1, 1], [], []>} : vector<16x768xf32>, vector<768x32xf32>, vector<16x32xf32> -> vector<16x32xf32>
    %19 = vector.shape_cast %18 : vector<16x32xf32> to vector<2x8x32xf32>
    %c0_19 = arith.constant 0 : index
    %c0_20 = arith.constant 0 : index
    %20 = vector.load %arg7[%c0_19, %c0_20] : memref<8x32xf32, #tpu.memory_space<vmem>>, vector<8x32xf32>
    %21 = vector.shape_cast %20 : vector<8x32xf32> to vector<1x8x32xf32>
    %22 = vector.broadcast %21 : vector<1x8x32xf32> to vector<2x8x32xf32>
    %23 = arith.addf %19, %22 : vector<2x8x32xf32>
    %c0_21 = arith.constant 0 : index
    %c0_22 = arith.constant 0 : index
    %c0_23 = arith.constant 0 : index
    %24 = vector.load %arg18[%c0_21, %c0_22, %c0_23] : memref<2x8x32xf32, #tpu.memory_space<vmem>>, vector<2x8x32xf32>
    tpu.vector_store %arg18[%c0_21, %c0_22, %c0_23], %23 {strides = array<i32>} : memref<2x8x32xf32, #tpu.memory_space<vmem>>, vector<2x8x32xf32>,
    %c0_24 = arith.constant 0 : index
    %c0_25 = arith.constant 0 : index
    %c0_26 = arith.constant 0 : index
    %25 = vector.load %arg8[%c0_24, %c0_25, %c0_26] : memref<2x4x1xf32, #tpu.memory_space<vmem>>, vector<2x4x1xf32>
    %c0_27 = arith.constant 0 : index
    %c0_28 = arith.constant 0 : index
    %26 = vector.load %arg9[%c0_27, %c0_28] : memref<1x32xf32, #tpu.memory_space<vmem>>, vector<1x32xf32>
    %27 = vector.shape_cast %26 : vector<1x32xf32> to vector<1x1x32xf32>
    %28 = vector.broadcast %25 : vector<2x4x1xf32> to vector<2x4x32xf32>
    %29 = vector.broadcast %27 : vector<1x1x32xf32> to vector<2x4x32xf32>
    %30 = arith.mulf %28, %29 : vector<2x4x32xf32>
    %c0_29 = arith.constant 0 : index
    %c0_30 = arith.constant 0 : index
    %31 = vector.load %arg10[%c0_29, %c0_30] : memref<4x32xf32, #tpu.memory_space<vmem>>, vector<4x32xf32>
    %32 = vector.shape_cast %31 : vector<4x32xf32> to vector<1x4x32xf32>
    %33 = vector.broadcast %32 : vector<1x4x32xf32> to vector<2x4x32xf32>
    %34 = arith.addf %30, %33 : vector<2x4x32xf32>
    %c0_31 = arith.constant 0 : index
    %c0_32 = arith.constant 0 : index
    %c0_33 = arith.constant 0 : index
    %35 = vector.load %arg19[%c0_31, %c0_32, %c0_33] : memref<2x4x32xf32, #tpu.memory_space<vmem>>, vector<2x4x32xf32>
    tpu.vector_store %arg19[%c0_31, %c0_32, %c0_33], %34 {strides = array<i32>} : memref<2x4x32xf32, #tpu.memory_space<vmem>>, vector<2x4x32xf32>,
    %c0_34 = arith.constant 0 : index
    %c0_35 = arith.constant 0 : index
    %c0_36 = arith.constant 0 : index
    %36 = vector.load %arg11[%c0_34, %c0_35, %c0_36] : memref<2x1x1xf32, #tpu.memory_space<vmem>>, vector<2x1x1xf32>
    %c0_37 = arith.constant 0 : index
    %c0_38 = arith.constant 0 : index
    %37 = vector.load %arg12[%c0_37, %c0_38] : memref<1x32xf32, #tpu.memory_space<vmem>>, vector<1x32xf32>
    %38 = vector.shape_cast %37 : vector<1x32xf32> to vector<1x1x32xf32>
    %39 = vector.broadcast %36 : vector<2x1x1xf32> to vector<2x1x32xf32>
    %40 = vector.broadcast %38 : vector<1x1x32xf32> to vector<2x1x32xf32>
    %41 = arith.mulf %39, %40 : vector<2x1x32xf32>
    %c0_39 = arith.constant 0 : index
    %c0_40 = arith.constant 0 : index
    %42 = vector.load %arg13[%c0_39, %c0_40] : memref<1x32xf32, #tpu.memory_space<vmem>>, vector<1x32xf32>
    %43 = vector.shape_cast %42 : vector<1x32xf32> to vector<1x1x32xf32>
    %44 = vector.broadcast %43 : vector<1x1x32xf32> to vector<2x1x32xf32>
    %45 = arith.addf %41, %44 : vector<2x1x32xf32>
    %c0_41 = arith.constant 0 : index
    %c0_42 = arith.constant 0 : index
    %c0_43 = arith.constant 0 : index
    %46 = vector.load %arg20[%c0_41, %c0_42, %c0_43] : memref<2x1x32xf32, #tpu.memory_space<vmem>>, vector<2x1x32xf32>
    tpu.vector_store %arg20[%c0_41, %c0_42, %c0_43], %45 {strides = array<i32>} : memref<2x1x32xf32, #tpu.memory_space<vmem>>, vector<2x1x32xf32>,
    %c0_44 = arith.constant 0 : index
    %c0_45 = arith.constant 0 : index
    %c0_46 = arith.constant 0 : index
    %47 = vector.load %arg14[%c0_44, %c0_45, %c0_46] : memref<2x1x1xf32, #tpu.memory_space<vmem>>, vector<2x1x1xf32>
    %c0_47 = arith.constant 0 : index
    %c0_48 = arith.constant 0 : index
    %48 = vector.load %arg15[%c0_47, %c0_48] : memref<1x32xf32, #tpu.memory_space<vmem>>, vector<1x32xf32>
    %49 = vector.shape_cast %48 : vector<1x32xf32> to vector<1x1x32xf32>
    %50 = vector.broadcast %47 : vector<2x1x1xf32> to vector<2x1x32xf32>
    %51 = vector.broadcast %49 : vector<1x1x32xf32> to vector<2x1x32xf32>
    %52 = arith.mulf %50, %51 : vector<2x1x32xf32>
    %c0_49 = arith.constant 0 : index
    %c0_50 = arith.constant 0 : index
    %53 = vector.load %arg16[%c0_49, %c0_50] : memref<1x32xf32, #tpu.memory_space<vmem>>, vector<1x32xf32>
    %54 = vector.shape_cast %53 : vector<1x32xf32> to vector<1x1x32xf32>
    %55 = vector.broadcast %54 : vector<1x1x32xf32> to vector<2x1x32xf32>
    %56 = arith.addf %52, %55 : vector<2x1x32xf32>
    %c0_51 = arith.constant 0 : index
    %c0_52 = arith.constant 0 : index
    %c0_53 = arith.constant 0 : index
    %57 = vector.load %arg21[%c0_51, %c0_52, %c0_53] : memref<2x1x32xf32, #tpu.memory_space<vmem>>, vector<2x1x32xf32>
    tpu.vector_store %arg21[%c0_51, %c0_52, %c0_53], %56 {strides = array<i32>} : memref<2x1x32xf32, #tpu.memory_space<vmem>>, vector<2x1x32xf32>,
    return
  }
  func.func @transform_0(%arg0: i32) -> (i32, i32, i32) {
    %c0_i32 = arith.constant 0 : i32
    %c0_i32_0 = arith.constant 0 : i32
    %c0_i32_1 = arith.constant 0 : i32
    %c0_i32_2 = arith.constant 0 : i32
    return %c0_i32, %c0_i32_0, %c0_i32_1 : i32, i32, i32
  }
  func.func @transform_1(%arg0: i32) -> (i32, i32) {
    %c0_i32 = arith.constant 0 : i32
    %c0_i32_0 = arith.constant 0 : i32
    %c0_i32_1 = arith.constant 0 : i32
    return %c0_i32, %c0_i32_0 : i32, i32
  }
  func.func @transform_2(%arg0: i32) -> (i32, i32) {
    %c0_i32 = arith.constant 0 : i32
    %c0_i32_0 = arith.constant 0 : i32
    %c0_i32_1 = arith.constant 0 : i32
    return %c0_i32, %c0_i32_0 : i32, i32
  }
  func.func @transform_3(%arg0: i32) -> (i32, i32) {
    %c0_i32 = arith.constant 0 : i32
    %c0_i32_0 = arith.constant 0 : i32
    %c0_i32_1 = arith.constant 0 : i32
    return %c0_i32, %c0_i32_0 : i32, i32
  }
  func.func @transform_4(%arg0: i32) -> (i32, i32, i32) {
    %c0_i32 = arith.constant 0 : i32
    %c0_i32_0 = arith.constant 0 : i32
    %c0_i32_1 = arith.constant 0 : i32
    %c0_i32_2 = arith.constant 0 : i32
    return %c0_i32, %c0_i32_0, %c0_i32_1 : i32, i32, i32
  }
  func.func @transform_5(%arg0: i32) -> (i32, i32) {
    %c0_i32 = arith.constant 0 : i32
    %c0_i32_0 = arith.constant 0 : i32
    %c0_i32_1 = arith.constant 0 : i32
    return %c0_i32, %c0_i32_0 : i32, i32
  }
  func.func @transform_6(%arg0: i32) -> (i32, i32) {
    %c0_i32 = arith.constant 0 : i32
    %c0_i32_0 = arith.constant 0 : i32
    %c0_i32_1 = arith.constant 0 : i32
    return %c0_i32, %c0_i32_0 : i32, i32
  }
  func.func @transform_7(%arg0: i32) -> (i32, i32, i32) {
    %c0_i32 = arith.constant 0 : i32
    %c0_i32_0 = arith.constant 0 : i32
    %c0_i32_1 = arith.constant 0 : i32
    %c0_i32_2 = arith.constant 0 : i32
    return %c0_i32, %c0_i32_0, %c0_i32_1 : i32, i32, i32
  }
  func.func @transform_8(%arg0: i32) -> (i32, i32) {
    %c0_i32 = arith.constant 0 : i32
    %c0_i32_0 = arith.constant 0 : i32
    %c0_i32_1 = arith.constant 0 : i32
    return %c0_i32, %c0_i32_0 : i32, i32
  }
  func.func @transform_9(%arg0: i32) -> (i32, i32) {
    %c0_i32 = arith.constant 0 : i32
    %c0_i32_0 = arith.constant 0 : i32
    %c0_i32_1 = arith.constant 0 : i32
    return %c0_i32, %c0_i32_0 : i32, i32
  }
  func.func @transform_10(%arg0: i32) -> (i32, i32, i32) {
    %c0_i32 = arith.constant 0 : i32
    %c0_i32_0 = arith.constant 0 : i32
    %c0_i32_1 = arith.constant 0 : i32
    %c0_i32_2 = arith.constant 0 : i32
    return %c0_i32, %c0_i32_0, %c0_i32_1 : i32, i32, i32
  }
  func.func @transform_11(%arg0: i32) -> (i32, i32) {
    %c0_i32 = arith.constant 0 : i32
    %c0_i32_0 = arith.constant 0 : i32
    %c0_i32_1 = arith.constant 0 : i32
    return %c0_i32, %c0_i32_0 : i32, i32
  }
  func.func @transform_12(%arg0: i32) -> (i32, i32) {
    %c0_i32 = arith.constant 0 : i32
    %c0_i32_0 = arith.constant 0 : i32
    %c0_i32_1 = arith.constant 0 : i32
    return %c0_i32, %c0_i32_0 : i32, i32
  }
  func.func @transform_13(%arg0: i32) -> (i32, i32, i32) {
    %c0_i32 = arith.constant 0 : i32
    %c0_i32_0 = arith.constant 0 : i32
    %c0_i32_1 = arith.constant 0 : i32
    %c0_i32_2 = arith.constant 0 : i32
    return %c0_i32, %c0_i32_0, %c0_i32_1 : i32, i32, i32
  }
  func.func @transform_14(%arg0: i32) -> (i32, i32) {
    %c0_i32 = arith.constant 0 : i32
    %c0_i32_0 = arith.constant 0 : i32
    %c0_i32_1 = arith.constant 0 : i32
    return %c0_i32, %c0_i32_0 : i32, i32
  }
  func.func @transform_15(%arg0: i32) -> (i32, i32) {
    %c0_i32 = arith.constant 0 : i32
    %c0_i32_0 = arith.constant 0 : i32
    %c0_i32_1 = arith.constant 0 : i32
    return %c0_i32, %c0_i32_0 : i32, i32
  }
  func.func @transform_16(%arg0: i32) -> (i32, i32, i32) {
    %c0_i32 = arith.constant 0 : i32
    %c0_i32_0 = arith.constant 0 : i32
    %c0_i32_1 = arith.constant 0 : i32
    %c0_i32_2 = arith.constant 0 : i32
    return %c0_i32, %c0_i32_0, %c0_i32_1 : i32, i32, i32
  }
  func.func @transform_17(%arg0: i32) -> (i32, i32, i32) {
    %c0_i32 = arith.constant 0 : i32
    %c0_i32_0 = arith.constant 0 : i32
    %c0_i32_1 = arith.constant 0 : i32
    %c0_i32_2 = arith.constant 0 : i32
    return %c0_i32, %c0_i32_0, %c0_i32_1 : i32, i32, i32
  }
  func.func @transform_18(%arg0: i32) -> (i32, i32, i32) {
    %c0_i32 = arith.constant 0 : i32
    %c0_i32_0 = arith.constant 0 : i32
    %c0_i32_1 = arith.constant 0 : i32
    %c0_i32_2 = arith.constant 0 : i32
    return %c0_i32, %c0_i32_0, %c0_i32_1 : i32, i32, i32
  }
  func.func @transform_19(%arg0: i32) -> (i32, i32, i32) {
    %c0_i32 = arith.constant 0 : i32
    %c0_i32_0 = arith.constant 0 : i32
    %c0_i32_1 = arith.constant 0 : i32
    %c0_i32_2 = arith.constant 0 : i32
    return %c0_i32, %c0_i32_0, %c0_i32_1 : i32, i32, i32
  }
  func.func @transform_20(%arg0: i32) -> (i32, i32, i32) {
    %c0_i32 = arith.constant 0 : i32
    %c0_i32_0 = arith.constant 0 : i32
    %c0_i32_1 = arith.constant 0 : i32
    %c0_i32_2 = arith.constant 0 : i32
    return %c0_i32, %c0_i32_0, %c0_i32_1 : i32, i32, i32
  }
}

</mosaic_0001>

<bundles_post_ra>
// kernel: embeddings_forward.1
= control target key start
LH: loop header
LB: loop body
LE: loop exit
PB: predicated region body
PF: predicated region fallthrough
CT: control target
= control target key end

     0   :  { %s1491_s0 = inlined_call_operand.vmem [shape: f32[2,16,48], index: 0, kind: input, shape index: {}]   ;;  %s1492_s1 = inlined_call_operand.vmem [shape: f32[48,32], index: 1, kind: input, shape index: {}]   ;;  %s1493_s2 = inlined_call_operand.vmem [shape: f32[16,32], index: 2, kind: input, shape index: {}]   ;;  %s1494_s3 = inlined_call_operand.vmem [shape: f32[1,32], index: 3, kind: input, shape index: {}]   ;;  %s1495_s4 = inlined_call_operand.vmem [shape: f32[2,8,768], index: 4, kind: input, shape index: {}]   ;;  %s1496_s5 = inlined_call_operand.vmem [shape: f32[768,32], index: 5, kind: input, shape index: {}]   ;;  %s1497_s6 = inlined_call_operand.vmem [shape: f32[8,32], index: 6, kind: input, shape index: {}]   ;;  %s1498_s7 = inlined_call_operand.vmem [shape: f32[2,4,1], index: 7, kind: input, shape index: {}]   ;;  %s1499_s8 = inlined_call_operand.vmem [shape: f32[1,32], index: 8, kind: input, shape index: {}]   ;;  %s1500_s9 = inlined_call_operand.vmem [shape: f32[4,32], index: 9, kind: input, shape index: {}]   ;;  %s1501_s10 = inlined_call_operand.vmem [shape: f32[2,1,1], index: 10, kind: input, shape index: {}]   ;;  %s1502_s11 = inlined_call_operand.vmem [shape: f32[1,32], index: 11, kind: input, shape index: {}]   ;;  %s1503_s12 = inlined_call_operand.vmem [shape: f32[1,32], index: 12, kind: input, shape index: {}]   ;;  %s1504_s13 = inlined_call_operand.vmem [shape: f32[2,1,1], index: 13, kind: input, shape index: {}]   ;;  %s1505_s14 = inlined_call_operand.vmem [shape: f32[1,32], index: 14, kind: input, shape index: {}]   ;;  %s1506_s15 = inlined_call_operand.vmem [shape: f32[1,32], index: 15, kind: input, shape index: {}]   ;;  %s1507_s16 = inlined_call_operand.vmem [shape: f32[2,17,32], index: 16, kind: output, shape index: {0}]   ;;  %s1508_s17 = inlined_call_operand.hbm [shape: f32[2,8,32], index: 17, kind: output, shape index: {1}]   ;;  %s1509_s18 = inlined_call_operand.hbm [shape: f32[2,4,32], index: 18, kind: output, shape index: {2}]   ;;  %s1510_s19 = inlined_call_operand.hbm [shape: f32[2,1,32], index: 19, kind: output, shape index: {3}]   ;;  %s1511_s20 = inlined_call_operand.hbm [shape: f32[2,1,32], index: 20, kind: output, shape index: {4}]  }
   0x1   :  { %1516 = sst [smem:[#allocation12_spill]] %s1491_s0 }
   0x2   :  { %1517 = sst [smem:[#allocation13_spill]] %s1492_s1 }
   0x3   :  { %1518 = sst [smem:[#allocation14_spill]] %s1493_s2 }
   0x4   :  { %1519 = sst [smem:[#allocation15_spill]] %s1494_s3 }
   0x5   :  { %1520 = sst [smem:[#allocation16_spill]] %s1495_s4 }
   0x6   :  { %26 = vsyncpa [#allocation3], 0 }
   0x7   :  { %27 = vsyncpa [#allocation5], 0  ;;  %s1521_s23 = sld [smem:[#allocation13_spill]]  ;;  %v227_v1 = vld [vmem:[%s1496_s5 + $0xf8] sm:$0xff]  ;;  %v226_v4 = vld [vmem:[%s1496_s5 + $0xf0] sm:$0xff]  ;;  %vm71_vm0 = vcmask 392192  }
   0x8   :  { %v211_v2 = vld [vmem:[%s1496_s5 + $0x78] sm:$0xff]  ;;  %687 = vmatprep.subr.mxu1 %v227_v1  ;;  %v210_v5 = vld [vmem:[%s1496_s5 + $0x70] sm:$0xff]  ;;  %v225_v7 = vld [vmem:[%s1496_s5 + $0xe8] sm:$0xff]  ;;  %s1522_s29 = sld [smem:[#allocation12_spill]] }
   0x9   :  { %688 = vmatpush3.msra.mxu1 %v211_v2  ;;  %v209_v8 = vld [vmem:[%s1496_s5 + $0x68] sm:$0xff]  ;;  %v224_v10 = vld [vmem:[%s1496_s5 + $0xe0] sm:$0xff]  ;;  %v223_v13 = vld [vmem:[%s1496_s5 + $0xd8] sm:$0xff]  ;;  %s1523_s28 = sld [smem:[#allocation16_spill]] }
   0xa   :  { %689 = vmatprep.subr.mxu1 %v226_v4  ;;  %v208_v11 = vld [vmem:[%s1496_s5 + $0x60] sm:$0xff]  ;;  %v207_v14 = vld [vmem:[%s1496_s5 + $0x58] sm:$0xff]  ;;  %v222_v16 = vld [vmem:[%s1496_s5 + $0xd0] sm:$0xff] }
   0xb   :  { %690 = vmatpush3.msra.mxu1 %v210_v5  ;;  %v206_v17 = vld [vmem:[%s1496_s5 + $0x50] sm:$0xff]  ;;  %v221_v19 = vld [vmem:[%s1496_s5 + $0xc8] sm:$0xff]  ;;  %v259_v20 = vld [vmem:[%s1496_s5 + $0x1f8] sm:$0xff] }
   0xc   :  { %691 = vmatprep.subr.mxu1 %v225_v7  ;;  %v205_v22 = vld [vmem:[%s1496_s5 + $0x48] sm:$0xff]  ;;  %v243_v23 = vld [vmem:[%s1496_s5 + $0x178] sm:$0xff]  ;;  %v220_v24 = vld [vmem:[%s1496_s5 + $0xc0] sm:$0xff] }
   0xd   :  { %v70_v0 = vld [vmem:[%s1521_s23 + $0x28] sm:$0xff]  ;;  %v69_v3 = vld [vmem:[%s1521_s23 + $0x20] sm:$0xff]  ;;  %v68_v6 = vld [vmem:[%s1521_s23 + $0x18] sm:$0xff]  ;;  %692 = vmatpush3.msra.mxu1 %v209_v8 }
   0xe   :  { %801 = vmatprep.subr.mxu0 %v70_v0  ;;  %v67_v9 = vld [vmem:[%s1521_s23 + $0x10] sm:$0xff]  ;;  %v66_v12 = vld [vmem:[%s1521_s23 + $0x8] sm:$0xff]  ;;  %693 = vmatprep.subr.mxu1 %v224_v10  ;;  %v65_v15 = vld [vmem:[%s1521_s23] sm:$0xff] }
   0xf   :  { %802 = vmatpush3.msra.mxu0 %v70_v0  ;;  %694 = vmatpush3.msra.mxu1 %v208_v11  ;;  %v61_v18 = vld [vmem:[%s1522_s29] sm:$0xff]  ;;  %v62_v21 = vld [vmem:[%s1522_s29 + $0x8] sm:$0xff]  ;;  %v258_v25 = vld [vmem:[%s1496_s5 + $0x1f0] sm:$0xff] }
  0x10   :  { %803 = vmatprep.subr.mxu0 %v69_v3  ;;  %695 = vmatprep.subr.mxu1 %v223_v13  ;;  %v204_v26 = vld [vmem:[%s1496_s5 + $0x40] sm:$0xff]  ;;  %v242_v27 = vld [vmem:[%s1496_s5 + $0x170] sm:$0xff]  ;;  %v219_v28 = vld [vmem:[%s1496_s5 + $0xb8] sm:$0xff] }
  0x11   :  { %804 = vmatpush3.msra.mxu0 %v69_v3  ;;  %696 = vmatpush3.msra.mxu1 %v207_v14  ;;  %v257_v29 = vld [vmem:[%s1496_s5 + $0x1e8] sm:$0xff]  ;;  %v203_v30 = vld [vmem:[%s1496_s5 + $0x38] sm:$0xff]  ;;  %v218_v32 = vld [vmem:[%s1496_s5 + $0xb0] sm:$0xff] }
  0x12   :  { %805 = vmatprep.subr.mxu0 %v68_v6  ;;  %697 = vmatprep.subr.mxu1 %v222_v16  ;;  %v241_v31 = vld [vmem:[%s1496_s5 + $0x168] sm:$0xff]  ;;  %v256_v33 = vld [vmem:[%s1496_s5 + $0x1e0] sm:$0xff]  ;;  %v202_v34 = vld [vmem:[%s1496_s5 + $0x30] sm:$0xff] }
  0x13   :  { %806 = vmatpush3.msra.mxu0 %v68_v6  ;;  %698 = vmatpush3.msra.mxu1 %v206_v17  ;;  %v240_v35 = vld [vmem:[%s1496_s5 + $0x160] sm:$0xff]  ;;  %v217_v36 = vld [vmem:[%s1496_s5 + $0xa8] sm:$0xff]  ;;  %v255_v37 = vld [vmem:[%s1496_s5 + $0x1d8] sm:$0xff] }
  0x14   :  { %807 = vmatprep.subr.mxu0 %v67_v9  ;;  %813 = vmatprep.mubr.msk.f32.mxu0 %vm71_vm0, %v61_v18  ;;  %v201_v38 = vld [vmem:[%s1496_s5 + $0x28] sm:$0xff]  ;;  %v239_v39 = vld [vmem:[%s1496_s5 + $0x158] sm:$0xff]  ;;  %v216_v40 = vld [vmem:[%s1496_s5 + $0xa0] sm:$0xff] }
  0x15   :  { %808 = vmatpush3.msra.mxu0 %v67_v9  ;;  %699 = vmatprep.subr.mxu1 %v221_v19  ;;  %v254_v41 = vld [vmem:[%s1496_s5 + $0x1d0] sm:$0xff]  ;;  %v200_v42 = vld [vmem:[%s1496_s5 + $0x20] sm:$0xff]  ;;  %v215_v44 = vld [vmem:[%s1496_s5 + $0x98] sm:$0xff] }
  0x16   :  { %809 = vmatprep.subr.mxu0 %v66_v12  ;;  %700 = vmatpush3.msra.mxu1 %v205_v22  ;;  %v238_v43 = vld [vmem:[%s1496_s5 + $0x150] sm:$0xff]  ;;  %v253_v45 = vld [vmem:[%s1496_s5 + $0x1c8] sm:$0xff]  ;;  %v199_v46 = vld [vmem:[%s1496_s5 + $0x18] sm:$0xff] }
  0x17   :  { %810 = vmatpush3.msra.mxu0 %v66_v12  ;;  %701 = vmatprep.subr.mxu1 %v220_v24  ;;  %v237_v47 = vld [vmem:[%s1496_s5 + $0x148] sm:$0xff]  ;;  %v214_v48 = vld [vmem:[%s1496_s5 + $0x90] sm:$0xff]  ;;  %v252_v49 = vld [vmem:[%s1496_s5 + $0x1c0] sm:$0xff] }
  0x18   :  { %811 = vmatprep.subr.mxu0 %v65_v15  ;;  %702 = vmatpush3.msra.mxu1 %v204_v26  ;;  %v198_v50 = vld [vmem:[%s1496_s5 + $0x10] sm:$0xff]  ;;  %v236_v51 = vld [vmem:[%s1496_s5 + $0x140] sm:$0xff]  ;;  %v213_v52 = vld [vmem:[%s1496_s5 + $0x88] sm:$0xff] }
  0x19   :  { %812 = vmatpush3.msra.mxu0 %v65_v15  ;;  %703 = vmatprep.subr.mxu1 %v219_v28  ;;  %v251_v53 = vld [vmem:[%s1496_s5 + $0x1b8] sm:$0xff]  ;;  %v197_v54 = vld [vmem:[%s1496_s5 + $0x8] sm:$0xff]  ;;  %v212_v56 = vld [vmem:[%s1496_s5 + $0x80] sm:$0xff] }
  0x1a   :  { %725 = vmatprep.subr.mxu0 %v259_v20  ;;  %814 = vmatmul.mubr.msk.f32.vlgmr.msra.gmra.mxu0 %vm71_vm0, %v62_v21  ;;  %v235_v55 = vld [vmem:[%s1496_s5 + $0x138] sm:$0xff]  ;;  %v250_v57 = vld [vmem:[%s1496_s5 + $0x1b0] sm:$0xff]  ;;  %v196_v58 = vld [vmem:[%s1496_s5] sm:$0xff] }
  0x1b   :  { %726 = vmatpush3.msra.mxu0 %v243_v23  ;;  %704 = vmatpush3.msra.mxu1 %v203_v30  ;;  %v185_v59 = vld [vmem:[%s1523_s28 + $0x8] sm:$0xff]  ;;  %v234_v60 = vld [vmem:[%s1496_s5 + $0x130] sm:$0xff]  ;;  %v184_v61 = vld [vmem:[%s1523_s28] sm:$0xff] }
  0x1c   :  { %727 = vmatprep.subr.mxu0 %v258_v25  ;;  %705 = vmatprep.subr.mxu1 %v218_v32  ;;  %v249_v62 = vld [vmem:[%s1496_s5 + $0x1a8] sm:$0xff]  ;;  %v291_v63 = vld [vmem:[%s1496_s5 + $0x2f8] sm:$0xff]  ;;  %v248_v2 = vld [vmem:[%s1496_s5 + $0x1a0] sm:$0xff] }
  0x1d   :  { %728 = vmatpush3.msra.mxu0 %v242_v27  ;;  %706 = vmatpush3.msra.mxu1 %v202_v34  ;;  %v233_v0 = vld [vmem:[%s1496_s5 + $0x128] sm:$0xff]  ;;  %v275_v1 = vld [vmem:[%s1496_s5 + $0x278] sm:$0xff]  ;;  %v290_v3 = vld [vmem:[%s1496_s5 + $0x2f0] sm:$0xff] }
  0x1e   :  { %729 = vmatprep.subr.mxu0 %v257_v29  ;;  %707 = vmatprep.subr.mxu1 %v217_v36  ;;  %v232_v4 = vld [vmem:[%s1496_s5 + $0x120] sm:$0xff]  ;;  %v274_v5 = vld [vmem:[%s1496_s5 + $0x270] sm:$0xff]  ;;  %v247_v6 = vld [vmem:[%s1496_s5 + $0x198] sm:$0xff] }
  0x1f   :  { %730 = vmatpush3.msra.mxu0 %v241_v31  ;;  %708 = vmatpush3.msra.mxu1 %v201_v38  ;;  %v289_v7 = vld [vmem:[%s1496_s5 + $0x2e8] sm:$0xff]  ;;  %v231_v8 = vld [vmem:[%s1496_s5 + $0x118] sm:$0xff]  ;;  %v246_v10 = vld [vmem:[%s1496_s5 + $0x190] sm:$0xff] }
  0x20   :  { %731 = vmatprep.subr.mxu0 %v256_v33  ;;  %709 = vmatprep.subr.mxu1 %v216_v40  ;;  %v273_v9 = vld [vmem:[%s1496_s5 + $0x268] sm:$0xff]  ;;  %v288_v11 = vld [vmem:[%s1496_s5 + $0x2e0] sm:$0xff]  ;;  %v63_v12 = vld [vmem:[%s1522_s29 + $0x10] sm:$0xff] }
  0x21   :  { %732 = vmatpush3.msra.mxu0 %v240_v35  ;;  %710 = vmatpush3.msra.mxu1 %v200_v42  ;;  %v230_v13 = vld [vmem:[%s1496_s5 + $0x110] sm:$0xff]  ;;  %v272_v14 = vld [vmem:[%s1496_s5 + $0x260] sm:$0xff]  ;;  %v64_v15 = vld [vmem:[%s1522_s29 + $0x18] sm:$0xff] }
  0x22   :  { %733 = vmatprep.subr.mxu0 %v255_v37  ;;  %711 = vmatprep.subr.mxu1 %v215_v44  ;;  %v245_v16 = vld [vmem:[%s1496_s5 + $0x188] sm:$0xff]  ;;  %v287_v17 = vld [vmem:[%s1496_s5 + $0x2d8] sm:$0xff] }
  0x23   :  { %734 = vmatpush3.msra.mxu0 %v239_v39  ;;  %712 = vmatpush3.msra.mxu1 %v199_v46 }
  0x24   :  { %735 = vmatprep.subr.mxu0 %v254_v41  ;;  %713 = vmatprep.subr.mxu1 %v214_v48 }
  0x25   :  { %736 = vmatpush3.msra.mxu0 %v238_v43  ;;  %714 = vmatpush3.msra.mxu1 %v198_v50 }
  0x26   :  { %737 = vmatprep.subr.mxu0 %v253_v45  ;;  %715 = vmatprep.subr.mxu1 %v213_v52 }
  0x27   :  { %738 = vmatpush3.msra.mxu0 %v237_v47  ;;  %716 = vmatpush3.msra.mxu1 %v197_v54 }
  0x28   :  { %739 = vmatprep.subr.mxu0 %v252_v49  ;;  %717 = vmatprep.subr.mxu1 %v212_v56 }
  0x29   :  { %740 = vmatpush3.msra.mxu0 %v236_v51  ;;  %718 = vmatpush3.msra.mxu1 %v196_v58 }
  0x2a   :  { %741 = vmatprep.subr.mxu0 %v251_v53  ;;  %356 = vmatprep.mubr.f32.mxu1 %v185_v59 }
  0x2b   :  { %742 = vmatpush3.msra.mxu0 %v235_v55  ;;  %357 = vmatmul.mubr.f32.vlgmr.msra.gmra.mxu1 %v184_v61 }
  0x2c   :  { %743 = vmatprep.subr.mxu0 %v250_v57  ;;  %763 = vmatprep.subr.mxu1 %v291_v63 }
  0x2d   :  { %744 = vmatpush3.msra.mxu0 %v234_v60  ;;  %764 = vmatpush3.msra.mxu1 %v275_v1 }
  0x2e   :  { %745 = vmatprep.subr.mxu0 %v249_v62  ;;  %765 = vmatprep.subr.mxu1 %v290_v3 }
  0x2f   :  { %746 = vmatpush3.msra.mxu0 %v233_v0  ;;  %766 = vmatpush3.msra.mxu1 %v274_v5 }
  0x30   :  { %747 = vmatprep.subr.mxu0 %v248_v2  ;;  %767 = vmatprep.subr.mxu1 %v289_v7 }
  0x31   :  { %748 = vmatpush3.msra.mxu0 %v232_v4  ;;  %768 = vmatpush3.msra.mxu1 %v273_v9 }
  0x32   :  { %749 = vmatprep.subr.mxu0 %v247_v6  ;;  %769 = vmatprep.subr.mxu1 %v288_v11 }
  0x33   :  { %750 = vmatpush3.msra.mxu0 %v231_v8 }
  0x34   :  { %751 = vmatprep.subr.mxu0 %v246_v10 }
  0x35   :  { %28 = vsyncpa [#allocation8], 0  ;;  %816 = vmatprep.mubr.msk.f32.mxu0 %vm71_vm0, %v63_v12  ;;  %752 = vmatpush3.msra.mxu0 %v230_v13  ;;  %v229_v18 = vld [vmem:[%s1496_s5 + $0x108] sm:$0xff]  ;;  %v271_v19 = vld [vmem:[%s1496_s5 + $0x258] sm:$0xff]  ;;  %v918_v41 = vmov 0   ;;  %vm181_vm1 = vcmask 253952   ;;  %v557_v62 = vlaneseq }
  0x36   :  { %770 = vmatpush3.msra.mxu1 %v272_v14  ;;  %817 = vmatmul.mubr.msk.f32.gmra.mxu0 %vm71_vm0, %v64_v15  ;;  %v244_v20 = vld [vmem:[%s1496_s5 + $0x180] sm:$0xff]  ;;  %v286_v21 = vld [vmem:[%s1496_s5 + $0x2d0] sm:$0xff]  ;;  %v187_v23 = vld [vmem:[%s1523_s28 + $0x18] sm:$0xff]  ;;  %s919_s26 = smov [#allocation7]   ;;  %vm546_vm2 = vcmask 257024  }
  0x37   :  { %753 = vmatprep.subr.mxu0 %v245_v16  ;;  %771 = vmatprep.subr.mxu1 %v287_v17  ;;  %v228_v22 = vld [vmem:[%s1496_s5 + $0x100] sm:$0xff]  ;;  %v270_v24 = vld [vmem:[%s1496_s5 + $0x250] sm:$0xff]  ;;  %v285_v26 = vld [vmem:[%s1496_s5 + $0x2c8] sm:$0xff]  ;;  %v558_v63 = vshrl.u32 %v557_v62, 7 }
  0x38   :  { %754 = vmatpush3.msra.mxu0 %v229_v18  ;;  %772 = vmatpush3.msra.mxu1 %v271_v19  ;;  %v186_v25 = vld [vmem:[%s1523_s28 + $0x10] sm:$0xff]  ;;  %v191_v27 = vld [vmem:[%s1523_s28 + $0x38] sm:$0xff]  ;;  %v269_v28 = vld [vmem:[%s1496_s5 + $0x248] sm:$0xff] }
  0x39   :  { %755 = vmatprep.subr.mxu0 %v244_v20  ;;  %773 = vmatprep.subr.mxu1 %v286_v21  ;;  %v193_v29 = vld [vmem:[%s1523_s28 + $0x48] sm:$0xff]  ;;  %v284_v30 = vld [vmem:[%s1496_s5 + $0x2c0] sm:$0xff]  ;;  %v190_v31 = vld [vmem:[%s1523_s28 + $0x30] sm:$0xff]  ;;  %v559_v0 = vsub.s32 0, %v558_v63 }
  0x3a   :  { %756 = vmatpush3.msra.mxu0 %v228_v22  ;;  %431 = vmatprep.mubr.f32.mxu0 %v187_v23  ;;  %v268_v32 = vld [vmem:[%s1496_s5 + $0x240] sm:$0xff]  ;;  %v283_v34 = vld [vmem:[%s1496_s5 + $0x2b8] sm:$0xff]  ;;  %v189_v35 = vld [vmem:[%s1523_s28 + $0x28] sm:$0xff] }
  0x3b   :  { %774 = vmatpush3.msra.mxu1 %v270_v24  ;;  %432 = vmatmul.mubr.f32.vlgmr.msra.gmra.mxu0 %v186_v25  ;;  %v192_v33 = vld [vmem:[%s1523_s28 + $0x40] sm:$0xff]  ;;  %v267_v36 = vld [vmem:[%s1496_s5 + $0x238] sm:$0xff]  ;;  %v282_v37 = vld [vmem:[%s1496_s5 + $0x2b0] sm:$0xff] }
  0x3c   :  { %775 = vmatprep.subr.mxu1 %v285_v26  ;;  %361 = vmatprep.mubr.f32.mxu1 %v191_v27  ;;  %v266_v38 = vld [vmem:[%s1496_s5 + $0x230] sm:$0xff]  ;;  %v577_v39 = vld [vmem:[%s1504_s13] sm:$0x1]  ;;  %v281_v40 = vld [vmem:[%s1496_s5 + $0x2a8] sm:$0xff] }
  0x3d   :  { %776 = vmatpush3.msra.mxu1 %v269_v28  ;;  %436 = vmatprep.mubr.f32.mxu0 %v193_v29  ;;  %v549_v42 = vld [vmem:[%s1501_s10] sm:$0x1]  ;;  %v265_v43 = vld [vmem:[%s1496_s5 + $0x228] sm:$0xff]  ;;  %v578_v46 = vld [vmem:[%s1504_s13 + $0x1] sm:$0x1]  ;;  %s648_s13 = sshll.u32 %s919_s26, 4  ;;  %s649_s13 = int_to_ptr.vmem [resolvable:$true] %s648_s13 }
  0x3e   :  { %777 = vmatprep.subr.mxu1 %v284_v30  ;;  %362 = vmatmul.mubr.f32.gmra.mxu1 %v190_v31  ;;  %v280_v44 = vld [vmem:[%s1496_s5 + $0x2a0] sm:$0xff]  ;;  %v279_v47 = vld [vmem:[%s1496_s5 + $0x298] sm:$0xff]  ;;  %v278_v50 = vld [vmem:[%s1496_s5 + $0x290] sm:$0xff]  ;;  %s832_s30 = scalar_lea.vmem %s649_s13, 32  ;;  %p837_p1 = scmp.lt.s32.totalorder %s649_s13, %s649_s13 }
  0x3f   :  { %778 = vmatpush3.msra.mxu1 %v268_v32  ;;  %437 = vmatmul.mubr.f32.gmra.mxu0 %v192_v33  ;;  %v264_v45 = vld [vmem:[%s1496_s5 + $0x220] sm:$0xff]  ;;  %v263_v49 = vld [vmem:[%s1496_s5 + $0x218] sm:$0xff]  ;;  %v262_v51 = vld [vmem:[%s1496_s5 + $0x210] sm:$0xff]  ;;  %p833_p0 = scmp.ne.s32.totalorder %s649_s13, %s832_s30  ;;  %p838_p2 = scmp.lt.s32.totalorder %s832_s30, %s832_s30 }
  0x40   :  { %779 = vmatprep.subr.mxu1 %v283_v34  ;;  %506 = vmatprep.mubr.f32.mxu1 %v189_v35  ;;  %v550_v48 = vld [vmem:[%s1501_s10 + $0x1] sm:$0x1]  ;;  %v523_v52 = vld [vmem:[%s1498_s7 + $0x4] sm:$0xf]  ;;  %v277_v53 = vld [vmem:[%s1496_s5 + $0x288] sm:$0xff]  ;;  %s1524_s10 = sld [smem:[#allocation15_spill]] }
  0x41   :  { %780 = vmatpush3.msra.mxu1 %v267_v36  ;;  %831 = vset.pattern.permute.xlu1 %v918_v41  ;;  %v522_v54 = vld [vmem:[%s1498_s7] sm:$0xf]  ;;  %v261_v55 = vld [vmem:[%s1496_s5 + $0x208] sm:$0xff]  ;;  %v195_v59 = vld [vmem:[%s1523_s28 + $0x58] sm:$0xff]  ;;  %p839_p3 = por %p838_p2, %p837_p1 }
  0x42   :  { %781 = vmatprep.subr.mxu1 %v282_v37  ;;  %830 = vset.pattern.permute.xlu0 %v918_v41  ;;  %v276_v56 = vld [vmem:[%s1496_s5 + $0x280] sm:$0xff]  ;;  %v194_v60 = vld [vmem:[%s1523_s28 + $0x50] sm:$0xff] }
  0x43   :  { %782 = vmatpush3.msra.mxu1 %v266_v38  ;;  %582 = vperm.xlu1 %831, %v577_v39   ;;  %v260_v57 = vld [vmem:[%s1496_s5 + $0x200] sm:$0xff]  ;;  %p840_p4 = pnand %p839_p3, %p833_p0 }
  0x44   :  { %783 = vmatprep.subr.mxu1 %v281_v40  ;;  %554 = vperm.xlu0 %830, %v549_v42   ;;  %v188_v58 = vld [vmem:[%s1523_s28 + $0x20] sm:$0xff] }
  0x45   :  { %784 = vmatpush3.msra.mxu1 %v265_v43  ;;  %v579_v1 = vld [vmem:[%s1505_s14] sm:$0x1] }
  0x46   :  { %785 = vmatprep.subr.mxu1 %v280_v44  ;;  %v180_v61 = vld [vmem:[%s1524_s10] sm:$0x1] }
  0x47   :  { %786 = vmatpush3.msra.mxu1 %v264_v45  ;;  %591 = vperm.xlu1 %831, %v578_v46   ;;  %182 = vst.msk [vmem:[%s1507_s16] sm:$0x1] %vm181_vm1, %v180_v61  ;;  %183 = vst.msk [vmem:[%s1507_s16 + $0x18] sm:$0x1] %vm181_vm1, %v180_v61  ;;  %v551_v4 = vld [vmem:[%s1502_s11] sm:$0x1] }
  0x48   :  { %787 = vmatprep.subr.mxu1 %v279_v47  ;;  %563 = vperm.xlu0 %830, %v550_v48   ;;  %v600_v6 = vld [vmem:[%s1506_s15] sm:$0x1]  ;;  %s920_s15 = smov [#allocation4]  }
  0x49   :  { %788 = vmatpush3.msra.mxu1 %v263_v49  ;;  %v572_v9 = vld [vmem:[%s1503_s12] sm:$0x1]  ;;  %s624_s27 = sshll.u32 %s920_s15, 4  ;;  %s1441_s27 = int_to_ptr.vmem [resolvable:$true] %s624_s27 }
  0x4a   :  { %789 = vmatprep.subr.mxu1 %v278_v50  ;;  %v676_v17 = vld [vmem:[%s1499_s8] ss:$0 sm:$0xff]  ;;  %s921_s8 = smov [#allocation6]  }
  0x4b   :  { %790 = vmatpush3.msra.mxu1 %v262_v51  ;;  %532 = vperm.xlu1 %831, %v523_v52   ;;  %v543_v20 = vld [vmem:[%s1500_s9] sm:$0xf]  ;;  %s636_s5 = sshll.u32 %s921_s8, 4  ;;  %s637_s5 = int_to_ptr.vmem [resolvable:$true] %s636_s5 }
  0x4c   :  { %791 = vmatprep.subr.mxu1 %v277_v53  ;;  %527 = vperm.xlu0 %830, %v522_v54  }
  0x4d   :  { %792 = vmatpush3.msra.mxu1 %v261_v55 }
  0x4e   :  { %793 = vmatprep.subr.mxu1 %v276_v56 }
  0x4f   :  { %794 = vmatpush3.msra.mxu1 %v260_v57 }
  0x50   :  { %507 = vmatmul.mubr.f32.vlgmr.msra.gmra.mxu1 %v188_v58 }
  0x51   :  { %511 = vmatprep.mubr.f32.mxu1 %v195_v59 }
  0x54   :  { %512 = vmatmul.mubr.f32.gmra.mxu1 %v194_v60 }
  0xbe   :  { %v583_v2 = vpop.permute.xlu1 %582 }
  0xbf   :  { %v588_v3 = vrot.slane %v583_v2, %v559_v0  ;;  %v555_v5 = vpop.permute.xlu0 %554 }
  0xc0   :  { %v560_v7 = vrot.slane %v555_v5, %v559_v0 }
  0xc1   :  { %v598_v8 = vmul.f32 %v588_v3, %v579_v1 }
  0xc2   :  { %v570_v10 = vmul.f32 %v560_v7, %v551_v4  ;;  %v592_v11 = vpop.permute.xlu1 %591 }
  0xc3   :  { %v601_v12 = vadd.f32 %v600_v6, %v598_v8  ;;  %v597_v13 = vrot.slane %v592_v11, %v559_v0  ;;  %v564_v14 = vpop.permute.xlu0 %563 }
  0xc4   :  { %v573_v15 = vadd.f32 %v572_v9, %v570_v10  ;;  %v569_v16 = vrot.slane %v564_v14, %v559_v0 }
  0xc5   :  { %603 = vst.msk [vmem:[#allocation7] sm:$0x1] %vm181_vm1, %v601_v12  ;;  %v599_v18 = vmul.f32 %v597_v13, %v579_v1 }
  0xc6   :  { %575 = vst.msk [vmem:[#allocation6] sm:$0x1] %vm181_vm1, %v573_v15  ;;  %v571_v19 = vmul.f32 %v569_v16, %v551_v4  ;;  %v533_v21 = vpop.permute.xlu1 %532 }
  0xc7   :  { %v602_v22 = vadd.f32 %v600_v6, %v599_v18  ;;  %v542_v23 = vmul.f32 %v676_v17, %v533_v21  ;;  %v528_v24 = vpop.permute.xlu0 %527 }
  0xc8   :  { %v574_v25 = vadd.f32 %v572_v9, %v571_v19  ;;  %v541_v26 = vmul.f32 %v676_v17, %v528_v24 }
  0xc9   :  { %604 = vst.msk [vmem:[#allocation7 + $0x1] sm:$0x1] %vm181_vm1, %v602_v22  ;;  %v545_v27 = vadd.f32 %v543_v20, %v542_v23 }
  0xca   :  { %576 = vst.msk [vmem:[#allocation6 + $0x1] sm:$0x1] %vm181_vm1, %v574_v25  ;;  %v544_v28 = vadd.f32 %v543_v20, %v541_v26 }
  0xcb   :  { %843 = shalt.err (!%p840_p4)
}
  0xcc   :  { %s922_s9 = smov 16   ;;  %s923_s10 = smov 1   ;;  %548 = vst.msk [vmem:[#allocation4 + $0x4] sm:$0xf] %vm546_vm2, %v545_v27  ;;  %547 = vst.msk [vmem:[#allocation4] sm:$0xf] %vm546_vm2, %v544_v28 }
  0xcd   :  { %654 = dma.vmem_to_hbm [thread:$0]  %s649_s13, 32, %s1511_s20, [#allocation8], %s922_s9, %s922_s9, %s923_s10  }
  0xce   :  { %s852_s21 = scalar_lea.vmem %s1441_s27, 128  ;;  %p857_p6 = scmp.lt.s32.totalorder %s1441_s27, %s1441_s27 }
  0xcf   :  { %p853_p5 = scmp.ne.s32.totalorder %s1441_s27, %s852_s21  ;;  %p858_p7 = scmp.lt.s32.totalorder %s852_s21, %s852_s21 }
  0xd1   :  { %p859_p8 = por %p858_p7, %p857_p6 }
  0xd3   :  { %p860_p9 = pnand %p859_p8, %p853_p5 }
  0xd5   :  { %863 = shalt.err (!%p860_p9)
}
  0xd6   :  { %s924_s1 = smov 64   ;;  %s925_s28 = smov 4  }
  0xd7   :  { %630 = dma.vmem_to_hbm [thread:$0]  %s1441_s27, 128, %s1509_s18, [#allocation5], %s924_s1, %s924_s1, %s925_s28  }
  0xd8   :  { %s872_s20 = scalar_lea.vmem %s637_s5, 32  ;;  %p877_p11 = scmp.lt.s32.totalorder %s637_s5, %s637_s5 }
  0xd9   :  { %p873_p10 = scmp.ne.s32.totalorder %s637_s5, %s872_s20  ;;  %p878_p12 = scmp.lt.s32.totalorder %s872_s20, %s872_s20 }
  0xdb   :  { %p879_p13 = por %p878_p12, %p877_p11 }
  0xdd   :  { %p880_p0 = pnand %p879_p13, %p873_p10 }
  0xdf   :  { %883 = shalt.err (!%p880_p0)
}
  0xe0   :  { %642 = dma.vmem_to_hbm [thread:$0]  %s637_s5, 32, %s1510_s19, [#allocation5], %s922_s9, %s922_s9, %s923_s10   ;;  %v815_v30 = vpop.f32.mrf.mxu0  ;;  %vm175_vm3 = vcmask 261120  }
  0xe1   :  { %s1525_s7 = sld [smem:[#allocation14_spill]]  ;;  %v517_v55 = vld [vmem:[%s1497_s6] sm:$0xff] }
  0xe2   :  { %v150_v33 = vpop.f32.mrf.mxu0 }
  0xe7   :  { %v170_v29 = vld [vmem:[%s1525_s7 + $0x8] sm:$0xff]  ;;  %v169_v31 = vld [vmem:[%s1525_s7] sm:$0xff] }
  0xe8   :  { %v172_v32 = vadd.f32 %v815_v30, %v170_v29  ;;  %v171_v34 = vadd.f32 %v169_v31, %v150_v33 }
  0xea   :  { %177 = vst.msk [vmem:[%s1507_s16 + $0x9] sm:$0xff] %vm175_vm3, %v172_v32  ;;  %176 = vst.msk [vmem:[%s1507_s16 + $0x1] sm:$0xff] %vm175_vm3, %v171_v34 }
  0xeb   :  { %v719_v39 = vpop.f32.mrf.mxu1 }
  0xed   :  { %v720_v41 = vpop.f32.mrf.mxu1 }
  0xee   :  { %v721_v49 = vadd.f32 %v720_v41, %v719_v39 }
  0xf6   :  { %v818_v35 = vpop.f32.mrf.mxu0 }
  0xf7   :  { %v174_v36 = vadd.f32 %v818_v35, %v170_v29 }
  0xf8   :  { %v160_v37 = vpop.f32.mrf.mxu0 }
  0xf9   :  { %179 = vst.msk [vmem:[%s1507_s16 + $0x21] sm:$0xff] %vm175_vm3, %v174_v36  ;;  %v173_v38 = vadd.f32 %v169_v31, %v160_v37 }
  0xfb   :  { %178 = vst.msk [vmem:[%s1507_s16 + $0x19] sm:$0xff] %vm175_vm3, %v173_v38  ;;  %v757_v40 = vpop.f32.mrf.mxu0  ;;  %s926_s16 = smov [#allocation2]  }
  0xfc   :  { %s612_s30 = sshll.u32 %s926_s16, 4  ;;  %s613_s30 = int_to_ptr.vmem [resolvable:$true] %s612_s30 }
  0xfd   :  { %v758_v42 = vpop.f32.mrf.mxu0  ;;  %s892_s9 = scalar_lea.vmem %s613_s30, 256  ;;  %p897_p2 = scmp.lt.s32.totalorder %s613_s30, %s613_s30 }
  0xfe   :  { %v722_v43 = vpop.f32.mrf.mxu1  ;;  %v759_v46 = vadd.f32 %v758_v42, %v757_v40  ;;  %p893_p1 = scmp.ne.s32.totalorder %s613_s30, %s892_s9  ;;  %p898_p3 = scmp.lt.s32.totalorder %s892_s9, %s892_s9 }
  0xff   :  { %v760_v44 = vpop.f32.mrf.mxu0 }
 0x100   :  { %v723_v45 = vpop.f32.mrf.mxu1  ;;  %v434_v51 = vadd.f32 %v759_v46, %v721_v49  ;;  %p899_p4 = por %p898_p3, %p897_p2 }
 0x101   :  { %v761_v47 = vpop.f32.mrf.mxu0  ;;  %v724_v52 = vadd.f32 %v723_v45, %v722_v43 }
 0x102   :  { %v762_v53 = vadd.f32 %v761_v47, %v760_v44  ;;  %p900_p5 = pnand %p899_p4, %p893_p1 }
 0x104   :  { %v439_v59 = vadd.f32 %v762_v53, %v724_v52 }
 0x110   :  { %v795_v48 = vpop.f32.mrf.mxu1 }
 0x112   :  { %v796_v50 = vpop.f32.mrf.mxu1 }
 0x113   :  { %v797_v54 = vadd.f32 %v796_v50, %v795_v48 }
 0x114   :  { %v798_v56 = vpop.f32.mrf.mxu1 }
 0x115   :  { %v509_v57 = vadd.f32 %v797_v54, %v434_v51 }
 0x116   :  { %v799_v58 = vpop.f32.mrf.mxu1 }
 0x117   :  { %v518_v60 = vadd.f32 %v517_v55, %v509_v57  ;;  %v800_v61 = vadd.f32 %v799_v58, %v798_v56 }
 0x119   :  { %520 = vst.msk [vmem:[#allocation2] sm:$0xff] %vm175_vm3, %v518_v60  ;;  %v514_v62 = vadd.f32 %v800_v61, %v439_v59 }
 0x11b   :  { %v519_v63 = vadd.f32 %v517_v55, %v514_v62 }
 0x11d   :  { %521 = vst.msk [vmem:[#allocation2 + $0x8] sm:$0xff] %vm175_vm3, %v519_v63 }
 0x11e   :  { %903 = shalt.err (!%p900_p5)
}
 0x11f   :  { %s927_s6 = smov 128   ;;  %s928_s10 = smov 8  }
 0x120   :  { %618 = dma.vmem_to_hbm [thread:$0]  %s613_s30, 256, %s1508_s17, [#allocation3], %s927_s6, %s927_s6, %s928_s10  }
 0x121   :  { %912 = dma.done.wait [#allocation3], 256  }
 0x122   :  { %913 = vsyncadd [#allocation3], 4294967040 }
 0x123   :  { %914 = dma.done.wait [#allocation5], 160  }
 0x124   :  { %915 = vsyncadd [#allocation5], 4294967136 }
 0x125   :  { %916 = dma.done.wait [#allocation8], 32  }
 0x126   :  { %917 = vsyncadd [#allocation8], 4294967264 }
 0x127   :  { %669 = vsyncpa [#allocation3], 1 }
 0x128   :  { %670 = vsyncpa [#allocation5], 1 }
 0x129   :  { %671 = vsyncpa [#allocation8], 1 }

</bundles_post_ra>
